<compile_context>
chip_gen: v7x
topology: tpu7x:2x2x1
jax: 0.10.0
libtpu: 0.0.40
codegen_flags: <defaults>
</compile_context>

<pallas_src>
import functools
import math

import jax
import jax.numpy as jnp
from jax.experimental import pallas as pl
from jax.experimental.pallas import tpu as pltpu


def _round_up(n, m):
    return ((n + m - 1) // m) * m


def _attention_kernel(x_ref, wc_ref, bin_ref, wout_ref, bout_ref,
                      out_ref, attnw_ref, xp_sc, concat_sc,
                      *, emb_dim, num_heads, lq, seq_true):
    """Grid step = (batch b, q-block qi).  x_ref holds batch b's full
    (padded) sequence; out/attnw refs hold this q-block's slabs."""
    E = emb_dim
    H = num_heads
    hd = E // H
    Lp = xp_sc.shape[0]
    qi = pl.program_id(1)

    # ---- q|k|v projection: once per batch (q-block 0), staged to bf16 VMEM.
    # The 1/sqrt(hd) scale is already folded into the q columns of wc/bin.
    @pl.when(qi == 0)
    def _():
        x = x_ref[...]                                           # (Lp, E) bf16
        for c in range(3):                                       # q | k | v
            chunk = jnp.dot(x, wc_ref[:, c * E:(c + 1) * E],
                            preferred_element_type=jnp.float32)
            chunk = chunk + bin_ref[0, c * E:(c + 1) * E]
            xp_sc[:, c * E:(c + 1) * E] = chunk.astype(jnp.bfloat16)

    # Static additive bias masking padded key columns (only if padding exists).
    mask_bias = None
    if Lp > seq_true:
        key_idx = jax.lax.broadcasted_iota(jnp.int32, (1, Lp), 1)
        mask_bias = jnp.where(key_idx < seq_true, 0.0, -1e30).astype(jnp.float32)

    q_start = pl.multiple_of(qi * lq, 8)

    # Head grouping so concat_sc stores are >=128-lane aligned when possible
    # (e.g. hd=64 -> pairs, hd=32 -> quads).
    if hd % 128 == 0:
        gsz = 1
    elif (128 % hd == 0) and (H % (128 // hd) == 0):
        gsz = 128 // hd
    else:
        gsz = 1                        # fallback: masked stores, still correct

    for g in range(H // gsz):
        parts = []
        for j in range(gsz):
            h = g * gsz + j
            lo = h * hd
            qh = xp_sc[pl.ds(q_start, lq), lo:lo + hd]           # (Lq, hd) bf16
            kh = xp_sc[:, E + lo:E + lo + hd]                    # (Lp, hd) bf16
            vh = xp_sc[:, 2 * E + lo:2 * E + lo + hd]            # (Lp, hd) bf16

            # q @ k^T without materializing a transpose (contract dim 1 x 1).
            s = jax.lax.dot_general(qh, kh, (((1,), (1,)), ((), ())),
                                    preferred_element_type=jnp.float32)
            if mask_bias is not None:
                s = s + mask_bias
            s = s - jnp.max(s, axis=-1, keepdims=True)
            p = jnp.exp(s)
            # Exact normalization: these probabilities are user-visible.
            p = p * (1.0 / jnp.sum(p, axis=-1, keepdims=True))

            if h == 0:
                attnw_ref[...] = p
            else:
                attnw_ref[...] += p

            oh = jnp.dot(p.astype(jnp.bfloat16), vh,
                         preferred_element_type=jnp.float32)     # (Lq, hd)
            parts.append(oh.astype(jnp.bfloat16))

        blk = parts[0] if gsz == 1 else jnp.concatenate(parts, axis=-1)
        concat_sc[:, g * gsz * hd:(g + 1) * gsz * hd] = blk      # aligned store

    attnw_ref[...] = attnw_ref[...] * (1.0 / H)

    # Single fused K=E out_proj (weight pre-transposed in the wrapper).
    out = jnp.dot(concat_sc[...], wout_ref[...],
                  preferred_element_type=jnp.float32) + bout_ref[0]
    out_ref[...] = out.astype(out_ref.dtype)


def fold_attention_params(params, *, emb_dim, num_heads):
    """One-time parameter preparation — call ONCE, outside the hot path.

    Folds the qkv Linear and the MHA in_proj into a single pre-transposed
    (E, 3E) weight, folds the 1/sqrt(head_dim) scale into the q block (weight
    and bias), pre-transposes out_proj, and casts weights to bf16.
    """
    E = emb_dim
    hd = E // num_heads
    scale = 1.0 / math.sqrt(hd)
    wqkv = params["wqkv"].astype(jnp.float32)    # (3E, E) qkv Linear (out, in)
    w_in = params["w_in"].astype(jnp.float32)    # (3E, E) MHA in_proj
    b_in = params["b_in"].astype(jnp.float32)    # (3E,)
    w_blocks, b_blocks = [], []
    for i in range(3):
        # q = x @ Wqkv[:E]^T @ Win[:E]^T + b  ==  x @ (Win[:E] @ Wqkv[:E])^T + b
        w = (w_in[i * E:(i + 1) * E] @ wqkv[i * E:(i + 1) * E]).T   # (E, E)
        b = b_in[i * E:(i + 1) * E]
        if i == 0:                       # fold softmax scale into the q path
            w = w * scale
            b = b * scale
        w_blocks.append(w)
        b_blocks.append(b)
    return {
        "w_comb": jnp.concatenate(w_blocks, axis=1).astype(jnp.bfloat16),  # (E, 3E)
        "b_comb": jnp.concatenate(b_blocks).reshape(1, 3 * E).astype(jnp.float32),
        "w_out_t": params["w_out"].T.astype(jnp.bfloat16),                 # (E, E)
        "b_out": params["b_out"].reshape(1, E).astype(jnp.float32),
    }


def _pick_vmem_limit_bytes():
    try:
        kind = jax.devices()[0].device_kind.lower()
    except Exception:
        kind = ""
    if "v5" in kind or "v6" in kind:
        return 64 * 1024 * 1024      # 128 MiB physical VMEM on v5e/v6e
    return 40 * 1024 * 1024          # v7x: 64 MiB physical, leave headroom


def attention_forward(x, folded_params, *, num_heads):
    """x: (L, N, E) float32 (PyTorch MultiheadAttention seq-first layout).

    Returns (attn_output (L, N, E) f32, attn_weights (N, L, L) f32).
    """
    L, N, E = x.shape
    assert E % num_heads == 0, "emb_dim must be divisible by num_heads"
    assert E % 128 == 0 or N == 1, "lane blocking requires E % 128 == 0 (or N == 1)"

    # Query tile size / padded sequence length (pad once, mask padded keys).
    if L > 128:
        lq = 128
    else:
        lq = _round_up(L, 8)
    Lp = _round_up(L, lq)
    nq = Lp // lq

    xb = x.astype(jnp.bfloat16)
    if Lp != L:
        xb = jnp.pad(xb, ((0, Lp - L), (0, 0), (0, 0)))
    x2 = xb.reshape(Lp, N * E)        # free reshape: (l, n, e) -> (l, n*E + e)

    kernel = functools.partial(_attention_kernel, emb_dim=E,
                               num_heads=num_heads, lq=lq, seq_true=L)

    out2, attnw = pl.pallas_call(
        kernel,
        out_shape=(
            jax.ShapeDtypeStruct((Lp, N * E), jnp.float32),
            jax.ShapeDtypeStruct((N, Lp, Lp), jnp.float32),
        ),
        grid_spec=pltpu.PrefetchScalarGridSpec(
            num_scalar_prefetch=0,
            grid=(N, nq),                                    # (batch, q-blocks)
            in_specs=[
                pl.BlockSpec((Lp, E), lambda b, q: (0, b)),  # batch b's whole seq
                pl.BlockSpec((E, 3 * E), lambda b, q: (0, 0)),   # folded qkv+in_proj
                pl.BlockSpec((1, 3 * E), lambda b, q: (0, 0)),   # folded in_proj bias
                pl.BlockSpec((E, E), lambda b, q: (0, 0)),       # out_proj weight^T
                pl.BlockSpec((1, E), lambda b, q: (0, 0)),       # out_proj bias
            ],
            out_specs=[
                pl.BlockSpec((lq, E), lambda b, q: (q, b)),          # out slab
                pl.BlockSpec((None, lq, Lp), lambda b, q: (b, q, 0)),  # attn weights
            ],
            scratch_shapes=[
                pltpu.VMEM((Lp, 3 * E), jnp.bfloat16),   # staged q|k|v projection
                pltpu.VMEM((lq, E), jnp.bfloat16),       # head-concat buffer
            ],
        ),
        compiler_params=pltpu.CompilerParams(
            dimension_semantics=("parallel", "arbitrary"),
            vmem_limit_bytes=_pick_vmem_limit_bytes()),
    )(x2, folded_params["w_comb"], folded_params["b_comb"],
      folded_params["w_out_t"], folded_params["b_out"])

    out = out2.reshape(Lp, N, E)[:L]     # back to (L, N, E), drop padded rows
    attnw = attnw[:, :L, :L]
    return out, attnw


def _reference(x, params, *, num_heads):
    """Pure-JAX f32 reference of the same math (PyTorch MHA semantics)."""
    L, N, E = x.shape
    hd = E // num_heads
    qkv = jnp.einsum("lne,fe->lnf", x, params["wqkv"])
    q, k, v = jnp.split(qkv, 3, axis=-1)
    w_in, b_in = params["w_in"], params["b_in"]
    qp = jnp.einsum("lne,fe->lnf", q, w_in[:E]) + b_in[:E]
    kp = jnp.einsum("lne,fe->lnf", k, w_in[E:2 * E]) + b_in[E:2 * E]
    vp = jnp.einsum("lne,fe->lnf", v, w_in[2 * E:]) + b_in[2 * E:]

    def heads(t):  # (L, N, E) -> (N, H, L, hd)
        return jnp.transpose(t.reshape(L, N, num_heads, hd), (1, 2, 0, 3))

    qh, kh, vh = heads(qp) / math.sqrt(hd), heads(kp), heads(vp)
    s = jnp.einsum("nhld,nhmd->nhlm", qh, kh)
    p = jax.nn.softmax(s, axis=-1)
    o = jnp.einsum("nhlm,nhmd->nhld", p, vh)            # (N, H, L, hd)
    o = jnp.transpose(o, (2, 0, 1, 3)).reshape(L, N, E)
    out = jnp.einsum("lne,fe->lnf", o, params["w_out"]) + params["b_out"]
    return out, jnp.mean(p, axis=1)


if __name__ == "__main__":
    def run_case(L, N, E, H, key):
        k0, k1, k2, k3, k4, k5 = jax.random.split(key, 6)
        params = {
            "wqkv": jax.random.normal(k1, (3 * E, E), jnp.float32) * 0.05,
            "w_in": jax.random.normal(k2, (3 * E, E), jnp.float32) * 0.05,
            "b_in": jax.random.normal(k3, (3 * E,), jnp.float32) * 0.01,
            "w_out": jax.random.normal(k4, (E, E), jnp.float32) * 0.05,
            "b_out": jax.random.normal(k5, (E,), jnp.float32) * 0.01,
        }
        x = jax.random.normal(k0, (L, N, E), jnp.float32)

        folded = fold_attention_params(params, emb_dim=E, num_heads=H)  # once
        out, attnw = attention_forward(x, folded, num_heads=H)
        jax.block_until_ready((out, attnw))

        ref_out, ref_w = _reference(x, params, num_heads=H)
        assert out.shape == (L, N, E) and attnw.shape == (N, L, L)
        # bf16 operands in the kernel -> looser tolerance than pure f32
        assert jnp.allclose(out, ref_out, atol=2e-2, rtol=2e-2), \
            f"out mismatch L={L}: {jnp.max(jnp.abs(out - ref_out))}"
        assert jnp.allclose(attnw, ref_w, atol=2e-2, rtol=2e-2), \
            f"attnw mismatch L={L}: {jnp.max(jnp.abs(attnw - ref_w))}"

    key = jax.random.PRNGKey(0)
    k_a, k_b = jax.random.split(key)
    # 1) single q-block, no padding (L multiple of 8)
    run_case(L=8, N=2, E=128, H=4, key=k_a)
    # 2) padded sequence + key masking + two q-blocks (exercises the q-tiled path)
    run_case(L=200, N=2, E=128, H=4, key=k_b)

    print("KERNEL_OK")
</pallas_src>

<mosaic_0001>
module attributes {stable_mosaic.version = 11 : i64} {
  func.func @_attention_kernel(%arg0: i32, %arg1: i32, %arg2: memref<8x128xbf16, #tpu.memory_space<vmem>>, %arg3: memref<128x384xbf16, #tpu.memory_space<vmem>>, %arg4: memref<1x384xf32, #tpu.memory_space<vmem>>, %arg5: memref<128x128xbf16, #tpu.memory_space<vmem>>, %arg6: memref<1x128xf32, #tpu.memory_space<vmem>>, %arg7: memref<8x128xf32, #tpu.memory_space<vmem>>, %arg8: memref<1x8x8xf32, #tpu.memory_space<vmem>>, %arg9: memref<8x384xbf16, #tpu.memory_space<vmem>>, %arg10: memref<8x128xbf16, #tpu.memory_space<vmem>>) attributes {dimension_semantics = [#tpu.dimension_semantics<parallel>, #tpu.dimension_semantics<arbitrary>], iteration_bounds = array<i64: 2, 1>, scalar_prefetch = 0 : i64, scratch_operands = 2 : i64, tpu.core_type = #tpu.core_type<tc>, window_params = [{transform_indices = @transform_0, window_bounds = array<i64: 8, 128>}, {pipeline_mode = #tpu.pipeline_mode<synchronous>, transform_indices = @transform_1, window_bounds = array<i64: 128, 384>}, {pipeline_mode = #tpu.pipeline_mode<synchronous>, transform_indices = @transform_2, window_bounds = array<i64: 1, 384>}, {pipeline_mode = #tpu.pipeline_mode<synchronous>, transform_indices = @transform_3, window_bounds = array<i64: 128, 128>}, {pipeline_mode = #tpu.pipeline_mode<synchronous>, transform_indices = @transform_4, window_bounds = array<i64: 1, 128>}, {transform_indices = @transform_5, window_bounds = array<i64: 8, 128>}, {transform_indices = @transform_6, window_bounds = array<i64: 1, 8, 8>}]} {
    %c0_i32 = arith.constant 0 : i32
    %0 = arith.cmpi eq, %arg1, %c0_i32 : i32
    %1 = arith.extui %0 : i1 to i32
    %c0_i32_0 = arith.constant 0 : i32
    %2 = arith.cmpi ne, %1, %c0_i32_0 : i32
    scf.if %2 {
      %c0_67 = arith.constant 0 : index
      %c0_68 = arith.constant 0 : index
      %120 = vector.load %arg2[%c0_67, %c0_68] : memref<8x128xbf16, #tpu.memory_space<vmem>>, vector<8x128xbf16>
      %c0_69 = arith.constant 0 : index
      %c0_70 = arith.constant 0 : index
      %121 = vector.load %arg3[%c0_69, %c0_70] : memref<128x384xbf16, #tpu.memory_space<vmem>>, vector<128x128xbf16>
      %cst_71 = arith.constant dense<0.000000e+00> : vector<8x128xf32>
      %122 = tpu.matmul %120, %121, %cst_71 {dimension_numbers = #tpu.dot_dimension_numbers<[1], [0], [0], [1], [0, 0, 1, 1], [], []>} : vector<8x128xbf16>, vector<128x128xbf16>, vector<8x128xf32> -> vector<8x128xf32>
      %c0_72 = arith.constant 0 : index
      %c0_73 = arith.constant 0 : index
      %123 = vector.load %arg4[%c0_72, %c0_73] : memref<1x384xf32, #tpu.memory_space<vmem>>, vector<1x128xf32>
      %124 = vector.shape_cast %123 : vector<1x128xf32> to vector<128xf32>
      %125 = vector.shape_cast %124 : vector<128xf32> to vector<1x128xf32>
      %126 = vector.broadcast %125 : vector<1x128xf32> to vector<8x128xf32>
      %127 = arith.addf %122, %126 : vector<8x128xf32>
      %128 = arith.truncf %127 : vector<8x128xf32> to vector<8x128xbf16>
      %c0_74 = arith.constant 0 : index
      %c0_75 = arith.constant 0 : index
      %129 = vector.load %arg9[%c0_74, %c0_75] : memref<8x384xbf16, #tpu.memory_space<vmem>>, vector<8x128xbf16>
      tpu.vector_store %arg9[%c0_74, %c0_75], %128 {strides = array<i32>} : memref<8x384xbf16, #tpu.memory_space<vmem>>, vector<8x128xbf16>,
      %c0_76 = arith.constant 0 : index
      %c128_77 = arith.constant 128 : index
      %130 = vector.load %arg3[%c0_76, %c128_77] : memref<128x384xbf16, #tpu.memory_space<vmem>>, vector<128x128xbf16>
      %cst_78 = arith.constant dense<0.000000e+00> : vector<8x128xf32>
      %131 = tpu.matmul %120, %130, %cst_78 {dimension_numbers = #tpu.dot_dimension_numbers<[1], [0], [0], [1], [0, 0, 1, 1], [], []>} : vector<8x128xbf16>, vector<128x128xbf16>, vector<8x128xf32> -> vector<8x128xf32>
      %c0_79 = arith.constant 0 : index
      %c128_80 = arith.constant 128 : index
      %132 = vector.load %arg4[%c0_79, %c128_80] : memref<1x384xf32, #tpu.memory_space<vmem>>, vector<1x128xf32>
      %133 = vector.shape_cast %132 : vector<1x128xf32> to vector<128xf32>
      %134 = vector.shape_cast %133 : vector<128xf32> to vector<1x128xf32>
      %135 = vector.broadcast %134 : vector<1x128xf32> to vector<8x128xf32>
      %136 = arith.addf %131, %135 : vector<8x128xf32>
      %137 = arith.truncf %136 : vector<8x128xf32> to vector<8x128xbf16>
      %c0_81 = arith.constant 0 : index
      %c128_82 = arith.constant 128 : index
      %138 = vector.load %arg9[%c0_81, %c128_82] : memref<8x384xbf16, #tpu.memory_space<vmem>>, vector<8x128xbf16>
      tpu.vector_store %arg9[%c0_81, %c128_82], %137 {strides = array<i32>} : memref<8x384xbf16, #tpu.memory_space<vmem>>, vector<8x128xbf16>,
      %c0_83 = arith.constant 0 : index
      %c256_84 = arith.constant 256 : index
      %139 = vector.load %arg3[%c0_83, %c256_84] : memref<128x384xbf16, #tpu.memory_space<vmem>>, vector<128x128xbf16>
      %cst_85 = arith.constant dense<0.000000e+00> : vector<8x128xf32>
      %140 = tpu.matmul %120, %139, %cst_85 {dimension_numbers = #tpu.dot_dimension_numbers<[1], [0], [0], [1], [0, 0, 1, 1], [], []>} : vector<8x128xbf16>, vector<128x128xbf16>, vector<8x128xf32> -> vector<8x128xf32>
      %c0_86 = arith.constant 0 : index
      %c256_87 = arith.constant 256 : index
      %141 = vector.load %arg4[%c0_86, %c256_87] : memref<1x384xf32, #tpu.memory_space<vmem>>, vector<1x128xf32>
      %142 = vector.shape_cast %141 : vector<1x128xf32> to vector<128xf32>
      %143 = vector.shape_cast %142 : vector<128xf32> to vector<1x128xf32>
      %144 = vector.broadcast %143 : vector<1x128xf32> to vector<8x128xf32>
      %145 = arith.addf %140, %144 : vector<8x128xf32>
      %146 = arith.truncf %145 : vector<8x128xf32> to vector<8x128xbf16>
      %c0_88 = arith.constant 0 : index
      %c256_89 = arith.constant 256 : index
      %147 = vector.load %arg9[%c0_88, %c256_89] : memref<8x384xbf16, #tpu.memory_space<vmem>>, vector<8x128xbf16>
      tpu.vector_store %arg9[%c0_88, %c256_89], %146 {strides = array<i32>} : memref<8x384xbf16, #tpu.memory_space<vmem>>, vector<8x128xbf16>,
    } else {
    }
    %c8_i32 = arith.constant 8 : i32
    %3 = arith.muli %arg1, %c8_i32 : i32
    %4 = tpu.assume_multiple %3, 8 : i32
    %5 = arith.index_cast %4 : i32 to index
    %c0 = arith.constant 0 : index
    %6 = vector.load %arg9[%5, %c0] : memref<8x384xbf16, #tpu.memory_space<vmem>>, vector<8x32xbf16>
    %c0_1 = arith.constant 0 : index
    %c128 = arith.constant 128 : index
    %7 = vector.load %arg9[%c0_1, %c128] : memref<8x384xbf16, #tpu.memory_space<vmem>>, vector<8x32xbf16>
    %c0_2 = arith.constant 0 : index
    %c256 = arith.constant 256 : index
    %8 = vector.load %arg9[%c0_2, %c256] : memref<8x384xbf16, #tpu.memory_space<vmem>>, vector<8x32xbf16>
    %cst = arith.constant dense<0.000000e+00> : vector<8x8xf32>
    %9 = tpu.matmul %6, %7, %cst {dimension_numbers = #tpu.dot_dimension_numbers<[1], [1], [0], [0], [0, 0, 1, 0], [], []>} : vector<8x32xbf16>, vector<8x32xbf16>, vector<8x8xf32> -> vector<8x8xf32>
    %cst_3 = arith.constant dense<0xFF800000> : vector<8xf32>
    %10 = vector.multi_reduction <maximumf>, %9, %cst_3 [1] : vector<8x8xf32> to vector<8xf32>
    %11 = vector.shape_cast %10 : vector<8xf32> to vector<8x1xf32>
    %12 = vector.broadcast %11 : vector<8x1xf32> to vector<8x8xf32>
    %13 = arith.subf %9, %12 : vector<8x8xf32>
    %14 = math.exp %13 : vector<8x8xf32>
    %cst_4 = arith.constant dense<0.000000e+00> : vector<8xf32>
    %15 = vector.multi_reduction <add>, %14, %cst_4 [1] : vector<8x8xf32> to vector<8xf32>
    %16 = vector.shape_cast %15 : vector<8xf32> to vector<8x1xf32>
    %cst_5 = arith.constant 1.000000e+00 : f32
    %17 = vector.broadcast %cst_5 : f32 to vector<8x1xf32>
    %18 = arith.divf %17, %16 : vector<8x1xf32>
    %19 = vector.broadcast %18 : vector<8x1xf32> to vector<8x8xf32>
    %20 = arith.mulf %14, %19 : vector<8x8xf32>
    %c0_6 = arith.constant 0 : index
    %c0_7 = arith.constant 0 : index
    %c0_8 = arith.constant 0 : index
    %21 = vector.load %arg8[%c0_6, %c0_7, %c0_8] : memref<1x8x8xf32, #tpu.memory_space<vmem>>, vector<1x8x8xf32>
    %22 = vector.shape_cast %21 : vector<1x8x8xf32> to vector<8x8xf32>
    %23 = vector.shape_cast %20 : vector<8x8xf32> to vector<1x8x8xf32>
    tpu.vector_store %arg8[%c0_6, %c0_7, %c0_8], %23 {strides = array<i32>} : memref<1x8x8xf32, #tpu.memory_space<vmem>>, vector<1x8x8xf32>,
    %24 = arith.truncf %20 : vector<8x8xf32> to vector<8x8xbf16>
    %cst_9 = arith.constant dense<0.000000e+00> : vector<8x32xf32>
    %25 = tpu.matmul %24, %8, %cst_9 {dimension_numbers = #tpu.dot_dimension_numbers<[1], [0], [0], [1], [0, 0, 1, 1], [], []>} : vector<8x8xbf16>, vector<8x32xbf16>, vector<8x32xf32> -> vector<8x32xf32>
    %26 = arith.truncf %25 : vector<8x32xf32> to vector<8x32xbf16>
    %27 = arith.index_cast %4 : i32 to index
    %c32 = arith.constant 32 : index
    %28 = vector.load %arg9[%27, %c32] : memref<8x384xbf16, #tpu.memory_space<vmem>>, vector<8x32xbf16>
    %c0_10 = arith.constant 0 : index
    %c160 = arith.constant 160 : index
    %29 = vector.load %arg9[%c0_10, %c160] : memref<8x384xbf16, #tpu.memory_space<vmem>>, vector<8x32xbf16>
    %c0_11 = arith.constant 0 : index
    %c288 = arith.constant 288 : index
    %30 = vector.load %arg9[%c0_11, %c288] : memref<8x384xbf16, #tpu.memory_space<vmem>>, vector<8x32xbf16>
    %cst_12 = arith.constant dense<0.000000e+00> : vector<8x8xf32>
    %31 = tpu.matmul %28, %29, %cst_12 {dimension_numbers = #tpu.dot_dimension_numbers<[1], [1], [0], [0], [0, 0, 1, 0], [], []>} : vector<8x32xbf16>, vector<8x32xbf16>, vector<8x8xf32> -> vector<8x8xf32>
    %cst_13 = arith.constant dense<0xFF800000> : vector<8xf32>
    %32 = vector.multi_reduction <maximumf>, %31, %cst_13 [1] : vector<8x8xf32> to vector<8xf32>
    %33 = vector.shape_cast %32 : vector<8xf32> to vector<8x1xf32>
    %34 = vector.broadcast %33 : vector<8x1xf32> to vector<8x8xf32>
    %35 = arith.subf %31, %34 : vector<8x8xf32>
    %36 = math.exp %35 : vector<8x8xf32>
    %cst_14 = arith.constant dense<0.000000e+00> : vector<8xf32>
    %37 = vector.multi_reduction <add>, %36, %cst_14 [1] : vector<8x8xf32> to vector<8xf32>
    %38 = vector.shape_cast %37 : vector<8xf32> to vector<8x1xf32>
    %cst_15 = arith.constant 1.000000e+00 : f32
    %39 = vector.broadcast %cst_15 : f32 to vector<8x1xf32>
    %40 = arith.divf %39, %38 : vector<8x1xf32>
    %41 = vector.broadcast %40 : vector<8x1xf32> to vector<8x8xf32>
    %42 = arith.mulf %36, %41 : vector<8x8xf32>
    %c0_16 = arith.constant 0 : index
    %c0_17 = arith.constant 0 : index
    %c0_18 = arith.constant 0 : index
    %43 = vector.load %arg8[%c0_16, %c0_17, %c0_18] : memref<1x8x8xf32, #tpu.memory_space<vmem>>, vector<1x8x8xf32>
    %44 = vector.shape_cast %43 : vector<1x8x8xf32> to vector<8x8xf32>
    %45 = arith.addf %44, %42 : vector<8x8xf32>
    %c0_19 = arith.constant 0 : index
    %c0_20 = arith.constant 0 : index
    %c0_21 = arith.constant 0 : index
    %46 = vector.load %arg8[%c0_19, %c0_20, %c0_21] : memref<1x8x8xf32, #tpu.memory_space<vmem>>, vector<1x8x8xf32>
    %47 = vector.shape_cast %46 : vector<1x8x8xf32> to vector<8x8xf32>
    %48 = vector.shape_cast %45 : vector<8x8xf32> to vector<1x8x8xf32>
    tpu.vector_store %arg8[%c0_19, %c0_20, %c0_21], %48 {strides = array<i32>} : memref<1x8x8xf32, #tpu.memory_space<vmem>>, vector<1x8x8xf32>,
    %49 = arith.truncf %42 : vector<8x8xf32> to vector<8x8xbf16>
    %cst_22 = arith.constant dense<0.000000e+00> : vector<8x32xf32>
    %50 = tpu.matmul %49, %30, %cst_22 {dimension_numbers = #tpu.dot_dimension_numbers<[1], [0], [0], [1], [0, 0, 1, 1], [], []>} : vector<8x8xbf16>, vector<8x32xbf16>, vector<8x32xf32> -> vector<8x32xf32>
    %51 = arith.truncf %50 : vector<8x32xf32> to vector<8x32xbf16>
    %52 = arith.index_cast %4 : i32 to index
    %c64 = arith.constant 64 : index
    %53 = vector.load %arg9[%52, %c64] : memref<8x384xbf16, #tpu.memory_space<vmem>>, vector<8x32xbf16>
    %c0_23 = arith.constant 0 : index
    %c192 = arith.constant 192 : index
    %54 = vector.load %arg9[%c0_23, %c192] : memref<8x384xbf16, #tpu.memory_space<vmem>>, vector<8x32xbf16>
    %c0_24 = arith.constant 0 : index
    %c320 = arith.constant 320 : index
    %55 = vector.load %arg9[%c0_24, %c320] : memref<8x384xbf16, #tpu.memory_space<vmem>>, vector<8x32xbf16>
    %cst_25 = arith.constant dense<0.000000e+00> : vector<8x8xf32>
    %56 = tpu.matmul %53, %54, %cst_25 {dimension_numbers = #tpu.dot_dimension_numbers<[1], [1], [0], [0], [0, 0, 1, 0], [], []>} : vector<8x32xbf16>, vector<8x32xbf16>, vector<8x8xf32> -> vector<8x8xf32>
    %cst_26 = arith.constant dense<0xFF800000> : vector<8xf32>
    %57 = vector.multi_reduction <maximumf>, %56, %cst_26 [1] : vector<8x8xf32> to vector<8xf32>
    %58 = vector.shape_cast %57 : vector<8xf32> to vector<8x1xf32>
    %59 = vector.broadcast %58 : vector<8x1xf32> to vector<8x8xf32>
    %60 = arith.subf %56, %59 : vector<8x8xf32>
    %61 = math.exp %60 : vector<8x8xf32>
    %cst_27 = arith.constant dense<0.000000e+00> : vector<8xf32>
    %62 = vector.multi_reduction <add>, %61, %cst_27 [1] : vector<8x8xf32> to vector<8xf32>
    %63 = vector.shape_cast %62 : vector<8xf32> to vector<8x1xf32>
    %cst_28 = arith.constant 1.000000e+00 : f32
    %64 = vector.broadcast %cst_28 : f32 to vector<8x1xf32>
    %65 = arith.divf %64, %63 : vector<8x1xf32>
    %66 = vector.broadcast %65 : vector<8x1xf32> to vector<8x8xf32>
    %67 = arith.mulf %61, %66 : vector<8x8xf32>
    %c0_29 = arith.constant 0 : index
    %c0_30 = arith.constant 0 : index
    %c0_31 = arith.constant 0 : index
    %68 = vector.load %arg8[%c0_29, %c0_30, %c0_31] : memref<1x8x8xf32, #tpu.memory_space<vmem>>, vector<1x8x8xf32>
    %69 = vector.shape_cast %68 : vector<1x8x8xf32> to vector<8x8xf32>
    %70 = arith.addf %69, %67 : vector<8x8xf32>
    %c0_32 = arith.constant 0 : index
    %c0_33 = arith.constant 0 : index
    %c0_34 = arith.constant 0 : index
    %71 = vector.load %arg8[%c0_32, %c0_33, %c0_34] : memref<1x8x8xf32, #tpu.memory_space<vmem>>, vector<1x8x8xf32>
    %72 = vector.shape_cast %71 : vector<1x8x8xf32> to vector<8x8xf32>
    %73 = vector.shape_cast %70 : vector<8x8xf32> to vector<1x8x8xf32>
    tpu.vector_store %arg8[%c0_32, %c0_33, %c0_34], %73 {strides = array<i32>} : memref<1x8x8xf32, #tpu.memory_space<vmem>>, vector<1x8x8xf32>,
    %74 = arith.truncf %67 : vector<8x8xf32> to vector<8x8xbf16>
    %cst_35 = arith.constant dense<0.000000e+00> : vector<8x32xf32>
    %75 = tpu.matmul %74, %55, %cst_35 {dimension_numbers = #tpu.dot_dimension_numbers<[1], [0], [0], [1], [0, 0, 1, 1], [], []>} : vector<8x8xbf16>, vector<8x32xbf16>, vector<8x32xf32> -> vector<8x32xf32>
    %76 = arith.truncf %75 : vector<8x32xf32> to vector<8x32xbf16>
    %77 = arith.index_cast %4 : i32 to index
    %c96 = arith.constant 96 : index
    %78 = vector.load %arg9[%77, %c96] : memref<8x384xbf16, #tpu.memory_space<vmem>>, vector<8x32xbf16>
    %c0_36 = arith.constant 0 : index
    %c224 = arith.constant 224 : index
    %79 = vector.load %arg9[%c0_36, %c224] : memref<8x384xbf16, #tpu.memory_space<vmem>>, vector<8x32xbf16>
    %c0_37 = arith.constant 0 : index
    %c352 = arith.constant 352 : index
    %80 = vector.load %arg9[%c0_37, %c352] : memref<8x384xbf16, #tpu.memory_space<vmem>>, vector<8x32xbf16>
    %cst_38 = arith.constant dense<0.000000e+00> : vector<8x8xf32>
    %81 = tpu.matmul %78, %79, %cst_38 {dimension_numbers = #tpu.dot_dimension_numbers<[1], [1], [0], [0], [0, 0, 1, 0], [], []>} : vector<8x32xbf16>, vector<8x32xbf16>, vector<8x8xf32> -> vector<8x8xf32>
    %cst_39 = arith.constant dense<0xFF800000> : vector<8xf32>
    %82 = vector.multi_reduction <maximumf>, %81, %cst_39 [1] : vector<8x8xf32> to vector<8xf32>
    %83 = vector.shape_cast %82 : vector<8xf32> to vector<8x1xf32>
    %84 = vector.broadcast %83 : vector<8x1xf32> to vector<8x8xf32>
    %85 = arith.subf %81, %84 : vector<8x8xf32>
    %86 = math.exp %85 : vector<8x8xf32>
    %cst_40 = arith.constant dense<0.000000e+00> : vector<8xf32>
    %87 = vector.multi_reduction <add>, %86, %cst_40 [1] : vector<8x8xf32> to vector<8xf32>
    %88 = vector.shape_cast %87 : vector<8xf32> to vector<8x1xf32>
    %cst_41 = arith.constant 1.000000e+00 : f32
    %89 = vector.broadcast %cst_41 : f32 to vector<8x1xf32>
    %90 = arith.divf %89, %88 : vector<8x1xf32>
    %91 = vector.broadcast %90 : vector<8x1xf32> to vector<8x8xf32>
    %92 = arith.mulf %86, %91 : vector<8x8xf32>
    %c0_42 = arith.constant 0 : index
    %c0_43 = arith.constant 0 : index
    %c0_44 = arith.constant 0 : index
    %93 = vector.load %arg8[%c0_42, %c0_43, %c0_44] : memref<1x8x8xf32, #tpu.memory_space<vmem>>, vector<1x8x8xf32>
    %94 = vector.shape_cast %93 : vector<1x8x8xf32> to vector<8x8xf32>
    %95 = arith.addf %94, %92 : vector<8x8xf32>
    %c0_45 = arith.constant 0 : index
    %c0_46 = arith.constant 0 : index
    %c0_47 = arith.constant 0 : index
    %96 = vector.load %arg8[%c0_45, %c0_46, %c0_47] : memref<1x8x8xf32, #tpu.memory_space<vmem>>, vector<1x8x8xf32>
    %97 = vector.shape_cast %96 : vector<1x8x8xf32> to vector<8x8xf32>
    %98 = vector.shape_cast %95 : vector<8x8xf32> to vector<1x8x8xf32>
    tpu.vector_store %arg8[%c0_45, %c0_46, %c0_47], %98 {strides = array<i32>} : memref<1x8x8xf32, #tpu.memory_space<vmem>>, vector<1x8x8xf32>,
    %99 = arith.truncf %92 : vector<8x8xf32> to vector<8x8xbf16>
    %cst_48 = arith.constant dense<0.000000e+00> : vector<8x32xf32>
    %100 = tpu.matmul %99, %80, %cst_48 {dimension_numbers = #tpu.dot_dimension_numbers<[1], [0], [0], [1], [0, 0, 1, 1], [], []>} : vector<8x8xbf16>, vector<8x32xbf16>, vector<8x32xf32> -> vector<8x32xf32>
    %101 = arith.truncf %100 : vector<8x32xf32> to vector<8x32xbf16>
    %102 = tpu.concatenate %26, %51, %76, %101 in 1 : vector<8x32xbf16>, vector<8x32xbf16>, vector<8x32xbf16>, vector<8x32xbf16> -> vector<8x128xbf16>
    %c0_49 = arith.constant 0 : index
    %c0_50 = arith.constant 0 : index
    %103 = vector.load %arg10[%c0_49, %c0_50] : memref<8x128xbf16, #tpu.memory_space<vmem>>, vector<8x128xbf16>
    tpu.vector_store %arg10[%c0_49, %c0_50], %102 {strides = array<i32>} : memref<8x128xbf16, #tpu.memory_space<vmem>>, vector<8x128xbf16>,
    %c0_51 = arith.constant 0 : index
    %c0_52 = arith.constant 0 : index
    %c0_53 = arith.constant 0 : index
    %104 = vector.load %arg8[%c0_51, %c0_52, %c0_53] : memref<1x8x8xf32, #tpu.memory_space<vmem>>, vector<1x8x8xf32>
    %105 = vector.shape_cast %104 : vector<1x8x8xf32> to vector<8x8xf32>
    %cst_54 = arith.constant 2.500000e-01 : f32
    %106 = vector.broadcast %cst_54 : f32 to vector<8x8xf32>
    %107 = arith.mulf %105, %106 : vector<8x8xf32>
    %c0_55 = arith.constant 0 : index
    %c0_56 = arith.constant 0 : index
    %c0_57 = arith.constant 0 : index
    %108 = vector.load %arg8[%c0_55, %c0_56, %c0_57] : memref<1x8x8xf32, #tpu.memory_space<vmem>>, vector<1x8x8xf32>
    %109 = vector.shape_cast %108 : vector<1x8x8xf32> to vector<8x8xf32>
    %110 = vector.shape_cast %107 : vector<8x8xf32> to vector<1x8x8xf32>
    tpu.vector_store %arg8[%c0_55, %c0_56, %c0_57], %110 {strides = array<i32>} : memref<1x8x8xf32, #tpu.memory_space<vmem>>, vector<1x8x8xf32>,
    %c0_58 = arith.constant 0 : index
    %c0_59 = arith.constant 0 : index
    %111 = vector.load %arg10[%c0_58, %c0_59] : memref<8x128xbf16, #tpu.memory_space<vmem>>, vector<8x128xbf16>
    %c0_60 = arith.constant 0 : index
    %c0_61 = arith.constant 0 : index
    %112 = vector.load %arg5[%c0_60, %c0_61] : memref<128x128xbf16, #tpu.memory_space<vmem>>, vector<128x128xbf16>
    %cst_62 = arith.constant dense<0.000000e+00> : vector<8x128xf32>
    %113 = tpu.matmul %111, %112, %cst_62 {dimension_numbers = #tpu.dot_dimension_numbers<[1], [0], [0], [1], [0, 0, 1, 1], [], []>} : vector<8x128xbf16>, vector<128x128xbf16>, vector<8x128xf32> -> vector<8x128xf32>
    %c0_63 = arith.constant 0 : index
    %c0_64 = arith.constant 0 : index
    %114 = vector.load %arg6[%c0_63, %c0_64] : memref<1x128xf32, #tpu.memory_space<vmem>>, vector<1x128xf32>
    %115 = vector.shape_cast %114 : vector<1x128xf32> to vector<128xf32>
    %116 = vector.shape_cast %115 : vector<128xf32> to vector<1x128xf32>
    %117 = vector.broadcast %116 : vector<1x128xf32> to vector<8x128xf32>
    %118 = arith.addf %113, %117 : vector<8x128xf32>
    %c0_65 = arith.constant 0 : index
    %c0_66 = arith.constant 0 : index
    %119 = vector.load %arg7[%c0_65, %c0_66] : memref<8x128xf32, #tpu.memory_space<vmem>>, vector<8x128xf32>
    tpu.vector_store %arg7[%c0_65, %c0_66], %118 {strides = array<i32>} : memref<8x128xf32, #tpu.memory_space<vmem>>, vector<8x128xf32>,
    return
  }
  func.func @transform_0(%arg0: i32, %arg1: i32) -> (i32, i32) {
    %c0_i32 = arith.constant 0 : i32
    %c0_i32_0 = arith.constant 0 : i32
    return %c0_i32, %arg0 : i32, i32
  }
  func.func @transform_1(%arg0: i32, %arg1: i32) -> (i32, i32) {
    %c0_i32 = arith.constant 0 : i32
    %c0_i32_0 = arith.constant 0 : i32
    %c0_i32_1 = arith.constant 0 : i32
    return %c0_i32, %c0_i32_0 : i32, i32
  }
  func.func @transform_2(%arg0: i32, %arg1: i32) -> (i32, i32) {
    %c0_i32 = arith.constant 0 : i32
    %c0_i32_0 = arith.constant 0 : i32
    %c0_i32_1 = arith.constant 0 : i32
    return %c0_i32, %c0_i32_0 : i32, i32
  }
  func.func @transform_3(%arg0: i32, %arg1: i32) -> (i32, i32) {
    %c0_i32 = arith.constant 0 : i32
    %c0_i32_0 = arith.constant 0 : i32
    %c0_i32_1 = arith.constant 0 : i32
    return %c0_i32, %c0_i32_0 : i32, i32
  }
  func.func @transform_4(%arg0: i32, %arg1: i32) -> (i32, i32) {
    %c0_i32 = arith.constant 0 : i32
    %c0_i32_0 = arith.constant 0 : i32
    %c0_i32_1 = arith.constant 0 : i32
    return %c0_i32, %c0_i32_0 : i32, i32
  }
  func.func @transform_5(%arg0: i32, %arg1: i32) -> (i32, i32) {
    %c0_i32 = arith.constant 0 : i32
    return %arg1, %arg0 : i32, i32
  }
  func.func @transform_6(%arg0: i32, %arg1: i32) -> (i32, i32, i32) {
    %c0_i32 = arith.constant 0 : i32
    %c0_i32_0 = arith.constant 0 : i32
    return %arg0, %arg1, %c0_i32 : i32, i32, i32
  }
}

</mosaic_0001>

<bundles_post_ra>
// kernel: tpu_custom_call.1
= control target key start
LH: loop header
LB: loop body
LE: loop exit
PB: predicated region body
PF: predicated region fallthrough
CT: control target
= control target key end

     0   :  { %12 = vsyncpa [#allocation5], 0  ;;  %s2554_s0 = inlined_call_operand.hbm [shape: bf16[8,256], index: 0, kind: input, shape index: {}]   ;;  %s2555_s1 = inlined_call_operand.hbm [shape: bf16[128,384], index: 1, kind: input, shape index: {}]   ;;  %s2556_s2 = inlined_call_operand.vmem [shape: f32[1,384], index: 2, kind: input, shape index: {}]   ;;  %s2557_s3 = inlined_call_operand.hbm [shape: bf16[128,128], index: 3, kind: input, shape index: {}]   ;;  %s2558_s4 = inlined_call_operand.vmem [shape: f32[1,128], index: 4, kind: input, shape index: {}]   ;;  %s2559_s5 = inlined_call_operand.hbm [shape: f32[8,256], index: 5, kind: output, shape index: {0}]   ;;  %s2560_s6 = inlined_call_operand.hbm [shape: f32[2,8,8], index: 6, kind: output, shape index: {1}]  }
   0x1   :  { %14 = vsyncpa [#allocation5 + $0x1], 0 }
   0x2   :  { %15 = vsyncpa [#allocation8], 0 }
   0x3   :  { %16 = vsyncpa [#allocation6], 0 }
   0x4   :  { %18 = vsyncpa [#allocation6 + $0x1], 0 }
   0x5   :  { %19 = vsyncpa [#allocation12], 0 }
   0x6   :  { %21 = vsyncpa [#allocation12 + $0x1], 0  ;;  %s2135_s21 = smov 0   ;;  %s2137_s22 = smov 0  }
   0x7   :  { %s2139_s23 = smov 0   ;;  %s2141_s24 = smov 0  }
   0x8   :  { %s2143_s25 = smov 0   ;;  %s2145_s26 = smov 0  }
   0x9 LB: > { %s1473_s27 = sadd.s32 4294967295, %s2084_s26   ;;  %s1474_s28 = sadd.s32 4294967294, %s2084_s26   ;;  %s2084_s26 = sphi %s2145_s26, %s27_s26   ;;  %s2080_s25 = sphi %s2143_s25, %s2585_s25   ;;  %s2076_s24 = sphi %s2141_s24, %s2584_s24   ;;  %s2072_s23 = sphi %s2139_s23, %s2583_s23   ;;  %s2068_s22 = sphi %s2137_s22, %s2582_s22   ;;  %s2064_s21 = sphi %s2135_s21, %s2581_s21  }
   0xa   : > { %p59_p0 = scmp.ne.s32.totalorder %s2068_s22, %s2064_s21  ;;  %p2169_p1 = scmp.eq.s32.totalorder %s1473_s27, 0 }
   0xb   : > { %p2173_p2 = scmp.eq.s32.totalorder %s1473_s27, 1  ;;  %p175_p3 = scmp.eq.s32.totalorder %s1474_s28, 1 }
   0xc   : > { %s2566_s29 = scalar_select %p2169_p1, 1, 0 }
   0xd   : > { %p2179_p4 = por %p2169_p1, %p59_p0  ;;  %p1475_p5 = scmp.ge.s32.totalorder %s2084_s26, 1 }
   0xe   : > { %p2184_p6 = por %p175_p3, %p59_p0  ;;  %p210_p7 = scmp.lt.s32.totalorder %s2084_s26, 3 }
   0xf   : > { %s2568_s7 = scalar_select %p2179_p4, 1, 0 }
  0x10   : > { %s2569_s8 = scalar_select %p2184_p6, 1, 0 }
  0x11   : > { %p2189_p8 = pnand %p1475_p5, %p210_p7  ;;  %s2086_s10 = smov [#allocation7]  }
  0x12   : > { %2570 = sst [smem:[#allocation17_spill]] %s2569_s8  ;;  %s222_s11 = sshll.u32 %s2086_s10, 4  ;;  %s2193_s11 = int_to_ptr.vmem [resolvable:$true] %s222_s11 }
  0x13   : > { %p1740_p9 = pneg %p2189_p8  ;;  %s2087_s13 = smov [#allocation9]  }
  0x14   : > { %s238_s14 = sshll.u32 %s2087_s13, 4  ;;  %s1880_s17 = scalar_lea.hbm %s2555_s1, 3072  ;;  %s2204_s14 = int_to_ptr.vmem [resolvable:$true] %s238_s14 }
  0x15   : > { %p2200_p11 = pnand %p1740_p9, %p2169_p1  ;;  %p1881_p12 = scmp.ne.s32.totalorder %s2555_s1, %s1880_s17 }
  0x16   : > { %p1887_p5 = scmp.lt.u32.totalorder %s1880_s17, %s2555_s1 }
  0x17   : > { %p1882_p13 = pneg %p2200_p11 }
  0x19   : > { %p1883_p0 = pnand %p1882_p13, %p1881_p12 }
  0x1b   : > { %p1884_p3 = pneg %p1883_p0 }
  0x1d   : > { %p1889_p7 = pnand %p1887_p5, %p1884_p3 }
  0x1f   : > { %1892 = shalt.err (!%p1889_p7)
}
  0x20   : > { %s1893_s28 = scalar_lea.vmem %s2193_s11, 3072  ;;  %p1901_p1 = scmp.lt.s32.totalorder %s2193_s11, %s2193_s11 }
  0x21   : > { %p1894_p9 = scmp.ne.s32.totalorder %s2193_s11, %s1893_s28  ;;  %p1902_p12 = scmp.lt.s32.totalorder %s1893_s28, %s1893_s28 }
  0x23   : > { %p1896_p10 = pnand %p1894_p9, %p1882_p13  ;;  %p1903_p0 = por %p1902_p12, %p1901_p1 }
  0x25   : > { %p1897_p6 = pneg %p1896_p10 }
  0x27   : > { %p1904_p4 = pnand %p1903_p0, %p1897_p6 }
  0x29   : > { %1907 = shalt.err (!%p1904_p4)
}
  0x2a   : > { %s2088_s10 = smov 192   ;;  %s2089_s13 = smov 12  }
  0x2b   : > { %1743 = dma.hbm_to_vmem [thread:$0]  (!%p2200_p11), %s2555_s1, 3072, %s2193_s11, [#allocation8], %s2088_s10, %s2088_s10, %s2089_s13  }
  0x2c   : > { %s1908_s19 = scalar_lea.hbm %s2557_s3, 1024 }
  0x2d   : > { %p1909_p1 = scmp.ne.s32.totalorder %s2557_s3, %s1908_s19  ;;  %p1915_p10 = scmp.lt.u32.totalorder %s1908_s19, %s2557_s3 }
  0x2f   : > { %p1911_p4 = pnand %p1909_p1, %p1882_p13 }
  0x31   : > { %p1912_p6 = pneg %p1911_p4 }
  0x33   : > { %p1917_p3 = pnand %p1915_p10, %p1912_p6 }
  0x35   : > { %1920 = shalt.err (!%p1917_p3)
}
  0x36   : > { %s1921_s11 = scalar_lea.vmem %s2204_s14, 1024  ;;  %p1929_p12 = scmp.lt.s32.totalorder %s2204_s14, %s2204_s14 }
  0x37   : > { %p1922_p5 = scmp.ne.s32.totalorder %s2204_s14, %s1921_s11  ;;  %p1930_p0 = scmp.lt.s32.totalorder %s1921_s11, %s1921_s11 }
  0x39   : > { %p1924_p7 = pnand %p1922_p5, %p1882_p13  ;;  %p1931_p1 = por %p1930_p0, %p1929_p12 }
  0x3b   : > { %p1925_p9 = pneg %p1924_p7 }
  0x3d   : > { %p1932_p4 = pnand %p1931_p1, %p1925_p9 }
  0x3f   : > { %1935 = shalt.err (!%p1932_p4)
}
  0x40   : > { %s2090_s8 = smov 64   ;;  %s2091_s10 = smov 4  }
  0x41   : > { %1746 = dma.hbm_to_vmem [thread:$0]  (!%p2200_p11), %s2557_s3, 1024, %s2204_s14, [#allocation8], %s2090_s8, %s2090_s8, %s2091_s10  }
  0x42   : > { %s39_s16 = sadd.s32 1, %s2080_s25  ;;  %s46_s17 = sadd.s32 1, %s2072_s23 }
  0x43   : > { %p41_p13 = scmp.ge.s32.totalorder %s39_s16, 2  ;;  %p53_p6 = scmp.ne.s32.totalorder %s2072_s23, %s2068_s22 }
  0x44   : > { %p54_p10 = scmp.eq.s32.totalorder %s2084_s26, 0  ;;  %p1760_p3 = scmp.lt.s32.totalorder %s2084_s26, 2 }
  0x45   : > { %s2587_s16 = smov (%p41_p13, %s39_s16), 0  ;;  %p2268_p7 = por %p2173_p2, %p53_p6 }
  0x46   : > { %p55_p5 = por %p54_p10, %p53_p6  ;;  %s43_s12 = ssub.s32 %s2080_s25, %s2587_s16 }
  0x47   : > { %s2573_s18 = scalar_select %p2268_p7, 1, 0 }
  0x48   : > { %s255_s19 = sand.u32 1, %s2072_s23   ;;  %p44_p9 = scmp.eq.s32.totalorder %s43_s12, 0 }
  0x49   : > { %s1479_s14 = sshll.u32 %s255_s19, 2  ;;  %s1480_s20 = sshll.u32 %s2080_s25, 6 }
  0x4a   : > { %s2277_s27 = scalar_select %p44_p9, %s2072_s23, %s46_s17  }
  0x4b   : > { %s2282_s8 = scalar_lea.hbm %s2554_s0, %s1480_s20  ;;  %s259_s30 = scalar_lea.vmem [#allocation4], %s1479_s14 }
  0x4c   : > { %s266_s10 = sshll.u32 %s259_s30, 4  ;;  %p2286_p2 = pnand %p1760_p3, %p55_p5  ;;  %s2290_s10 = int_to_ptr.vmem [resolvable:$true] %s266_s10 }
  0x4d   : > { %s256_s15 = scalar_lea.sflag [#allocation5], %s255_s19  ;;  %s1936_s17 = scalar_lea.hbm %s2282_s8, 64 }
  0x4e   : > { %p1937_p11 = scmp.ne.s32.totalorder %s2282_s8, %s1936_s17  ;;  %p1938_p12 = pneg %p2286_p2 }
  0x4f   : > { %s1941_s20 = scalar_lea.hbm %s2554_s0, 128  ;;  %p1942_p4 = scmp.lt.u32.totalorder %s2282_s8, %s2554_s0 }
  0x50   : > { %p1939_p0 = pnand %p1938_p12, %p1937_p11  ;;  %p1943_p13 = scmp.lt.u32.totalorder %s1941_s20, %s1936_s17 }
  0x51   : > { %p1945_p10 = scmp.lt.u32.totalorder %s1936_s17, %s2282_s8 }
  0x52   : > { %p1940_p1 = pneg %p1939_p0  ;;  %p1944_p6 = por %p1943_p13, %p1942_p4 }
  0x54   : > { %p1946_p3 = por %p1945_p10, %p1944_p6 }
  0x56   : > { %p1947_p5 = pnand %p1946_p3, %p1940_p1 }
  0x58   : > { %1950 = shalt.err (!%p1947_p5)
}
  0x59   : > { %s1951_s19 = scalar_lea.vmem %s2290_s10, 64  ;;  %s2092_s30 = smov [#allocation4]  }
  0x5a   : > { %p1952_p9 = scmp.ne.s32.totalorder %s2290_s10, %s1951_s19  ;;  %s1956_s12 = sshll.u32 %s2092_s30, 4  ;;  %s1957_s12 = int_to_ptr.vmem [resolvable:$false] %s1956_s12 }
  0x5b   : > { %s1958_s14 = scalar_lea.vmem %s1957_s12, 128  ;;  %p1959_p7 = scmp.lt.s32.totalorder %s2290_s10, %s1957_s12 }
  0x5c   : > { %p1954_p11 = pnand %p1952_p9, %p1938_p12  ;;  %p1960_p4 = scmp.lt.s32.totalorder %s1958_s14, %s1951_s19 }
  0x5e   : > { %p1955_p0 = pneg %p1954_p11  ;;  %p1961_p13 = por %p1960_p4, %p1959_p7 }
  0x60   : > { %p1962_p6 = pnand %p1961_p13, %p1955_p0 }
  0x62   : > { %1965 = shalt.err (!%p1962_p6)
}
  0x63   : > { %1750 = dma.hbm_to_vmem [thread:$0]  (!%p2286_p2), %s2282_s8, 64, %s2290_s10, %s256_s15  }
  0x64   : > { %275 = sbr.rel (%p2189_p8) target bundleno = 3079 (0xc07), region = 40  ;;  %s2320_s17 = sand.u32 (!%p2189_p8), 1, %s2068_s22  }
  0x65   : > { %s1482_s20 = sshll.u32 (!%p2189_p8), %s2320_s17, 2  ;;  %s278_s28 = scalar_lea.sflag (!%p2189_p8), [#allocation5], %s2320_s17 }
  0x66   : > { %s2324_s11 = scalar_lea.vmem (!%p2189_p8), [#allocation4], %s1482_s20  ;;  %p2575_p7 = scmp.ne.s32.totalorder (!%p2189_p8), %s2568_s7, 0 }
  0x6b   : > { %2047 = dma.done.wait (%p2575_p7), %s278_s28, 64  }
  0x6c   : > { %2049 = vsyncadd (%p2575_p7), %s278_s28, 4294967232  ;;  %p2576_p2 = scmp.ne.s32.totalorder %s2566_s29, 0 }
  0x6e   : > { %2051 = dma.done.wait (%p2576_p2), [#allocation8], 4096  }
  0x6f   : > { %2053 = vsyncadd (%p2576_p2), [#allocation8], 4294963200  ;;  %v2093_v0 = vmov 0.0   ;;  %vm2094_vm0 = vmmov 0   ;;  %v1823_v1 = vld [vmem:[#allocation7 + $0x4] ss:$12 sps:$4 sm:$0xff]  }
  0x70   : > { %1618 = vmatprep.subr.bf16.mxu1 %v2093_v0  ;;  %1598 = vmatprep.subr.bf16.mxu0 %v2093_v0  ;;  %v1824_v2 = vld [vmem:[#allocation7 + $0x1c] ss:$12 sps:$4 sm:$0xff]   ;;  %v1825_v3 = vld [vmem:[#allocation7] ss:$12 sps:$4 sm:$0xff]   ;;  %v1827_v4 = vld [vmem:[#allocation7 + $0x18] ss:$12 sps:$4 sm:$0xff]  }
  0x71   : > { %1634 = vmatprep.mubr.msk.bf16.mxu1 %vm2094_vm0, %v2093_v0  ;;  %1614 = vmatprep.mubr.msk.bf16.mxu0 %vm2094_vm0, %v2093_v0  ;;  %v1826_v5 = vld [vmem:[#allocation7 + $0x34] ss:$12 sps:$4 sm:$0xff]   ;;  %v1829_v6 = vld [vmem:[#allocation7 + $0x30] ss:$12 sps:$4 sm:$0xff]   ;;  %v1828_v7 = vld [vmem:[#allocation7 + $0x4c] ss:$12 sps:$4 sm:$0xff]  }
  0x72   : > { %1619 = vmatpush3.bf16.msra.mxu1 %v1823_v1  ;;  %1599 = vmatpush3.bf16.msra.mxu0 %v1825_v3  ;;  %v1831_v8 = vld [vmem:[#allocation7 + $0x48] ss:$12 sps:$4 sm:$0xff]   ;;  %v1830_v9 = vld [vmem:[#allocation7 + $0x64] ss:$12 sps:$4 sm:$0xff]   ;;  %v1833_v11 = vld [vmem:[#allocation7 + $0x60] ss:$12 sps:$4 sm:$0xff]  }
  0x73   : > { %1620 = vmatprep.subr.bf16.mxu1 %v2093_v0  ;;  %1600 = vmatprep.subr.bf16.mxu0 %v2093_v0  ;;  %v1832_v10 = vld [vmem:[#allocation7 + $0x7c] ss:$12 sps:$4 sm:$0xff]   ;;  %v1835_v12 = vld [vmem:[#allocation7 + $0x78] ss:$12 sps:$4 sm:$0xff]   ;;  %v1834_v13 = vld [vmem:[#allocation7 + $0x94] ss:$12 sps:$4 sm:$0xff]  }
  0x74   : > { %v1837_v14 = vld [vmem:[#allocation7 + $0x90] ss:$12 sps:$4 sm:$0xff]   ;;  %v1836_v15 = vld [vmem:[#allocation7 + $0xac] ss:$12 sps:$4 sm:$0xff]   ;;  %v1838_v16 = vld [vmem:[#allocation7 + $0xa8] ss:$12 sps:$4 sm:$0xff]  }
  0x75   : > { %v328_v17 = vld [vmem:[%s2324_s11] sm:$0xf]  ;;  %v1496_v18 = vld [vmem:[%s2556_s2 + $0x1] ss:$0 sm:$0xff]  ;;  %v1487_v20 = vld [vmem:[%s2556_s2] ss:$0 sm:$0xff] }
  0x76   : > { %1621 = vmatpush3.bf16.msra.mxu1 %v1824_v2  ;;  %1601 = vmatpush3.bf16.msra.mxu0 %v1827_v4  ;;  %vm677_vm1 = vcmask 261120   ;;  %s2095_s10 = smov 96   ;;  %v1841_v37 = vld [vmem:[#allocation7 + $0x8] ss:$12 sps:$4 sm:$0xff]   ;;  %v1842_v38 = vld [vmem:[#allocation7 + $0x20] ss:$12 sps:$4 sm:$0xff]  }
  0x77   : > { %1622 = vmatprep.subr.bf16.mxu1 %v2093_v0  ;;  %1602 = vmatprep.subr.bf16.mxu0 %v2093_v0  ;;  %v1843_v39 = vld [vmem:[#allocation7 + $0x38] ss:$12 sps:$4 sm:$0xff]   ;;  %v1844_v40 = vld [vmem:[#allocation7 + $0x50] ss:$12 sps:$4 sm:$0xff]   ;;  %v1845_v41 = vld [vmem:[#allocation7 + $0x68] ss:$12 sps:$4 sm:$0xff]  }
  0x78   : > { %v1846_v42 = vld [vmem:[#allocation7 + $0x80] ss:$12 sps:$4 sm:$0xff]   ;;  %v1847_v43 = vld [vmem:[#allocation7 + $0x98] ss:$12 sps:$4 sm:$0xff]   ;;  %v1848_v44 = vld [vmem:[#allocation7 + $0xb0] ss:$12 sps:$4 sm:$0xff]  }
  0x79   : > { %vm724_vm2 = vcmask 64512   ;;  %v1505_v50 = vld [vmem:[%s2556_s2 + $0x2] ss:$0 sm:$0xff]  ;;  %vm742_vm3 = vcmask 1043456   ;;  %s1485_s19 = sshll.u32 %s2320_s17, 3  ;;  %s2096_s12 = smov 64  }
  0x7a   : > { %1623 = vmatpush3.bf16.msra.mxu1 %v1826_v5  ;;  %1603 = vmatpush3.bf16.msra.mxu0 %v1829_v6  ;;  %s2394_s30 = scalar_lea.vmem [#allocation11], %s1485_s19  ;;  %s2097_s14 = smov 32   ;;  %vm1180_vm4 = vcmask 523264   ;;  %vm1183_vm5 = vcmask 785408  }
  0x7b   : > { %1624 = vmatprep.subr.bf16.mxu1 %v2093_v0  ;;  %1604 = vmatprep.subr.bf16.mxu0 %v2093_v0  ;;  %s1542_s20 = sshll.u32 %s2076_s24, 7  ;;  %s1339_s7 = sshll.u32 %s2394_s30, 4  ;;  %s1340_s7 = int_to_ptr.vmem [resolvable:$true] %s1339_s7 }
  0x7c   : > { %s2474_s29 = scalar_lea.hbm %s2560_s6, %s1542_s20  ;;  %s1310_s9 = scalar_lea.sflag [#allocation12], %s2320_s17 }
  0x7d   : > { %s1966_s8 = scalar_lea.vmem %s1340_s7, 128  ;;  %p2577_p12 = scmp.ne.s32.totalorder %s2573_s18, 0 }
  0x7e   : > { %1625 = vmatpush3.bf16.msra.mxu1 %v1828_v7  ;;  %1605 = vmatpush3.bf16.msra.mxu0 %v1831_v8  ;;  %p1967_p8 = scmp.ne.s32.totalorder %s1340_s7, %s1966_s8 }
  0x7f   : > { %1626 = vmatprep.subr.bf16.mxu1 %v2093_v0  ;;  %1606 = vmatprep.subr.bf16.mxu0 %v2093_v0 }
  0x80   : > { %p1968_p1 = pnand %p1967_p8, %p2577_p12 }
  0x82   : > { %1627 = vmatpush3.bf16.msra.mxu1 %v1830_v9  ;;  %1607 = vmatpush3.bf16.msra.mxu0 %v1833_v11  ;;  %p1969_p10 = pneg %p1968_p1 }
  0x83   : > { %1628 = vmatprep.subr.bf16.mxu1 %v2093_v0  ;;  %1608 = vmatprep.subr.bf16.mxu0 %v2093_v0 }
  0x86   : > { %1629 = vmatpush3.bf16.msra.mxu1 %v1832_v10  ;;  %1609 = vmatpush3.bf16.msra.mxu0 %v1835_v12 }
  0x87   : > { %1630 = vmatprep.subr.bf16.mxu1 %v2093_v0  ;;  %1610 = vmatprep.subr.bf16.mxu0 %v2093_v0 }
  0x8a   : > { %1631 = vmatpush3.bf16.msra.mxu1 %v1834_v13  ;;  %1611 = vmatpush3.bf16.msra.mxu0 %v1837_v14 }
  0x8b   : > { %1632 = vmatprep.subr.bf16.mxu1 %v2093_v0  ;;  %1612 = vmatprep.subr.bf16.mxu0 %v2093_v0 }
  0x8e   : > { %1633 = vmatpush3.bf16.msra.mxu1 %v1836_v15  ;;  %1613 = vmatpush3.bf16.msra.mxu0 %v1838_v16 }
  0x8f   : > { %1658 = vmatprep.subr.bf16.mxu1 %v2093_v0  ;;  %1638 = vmatprep.subr.bf16.mxu0 %v2093_v0 }
  0x91   : > { %1635 = vmatmul.mubr.bf16.vlgmr.msra.gmra.mrb[0].mxu1 %v328_v17  ;;  %1615 = vmatmul.mubr.bf16.vlgmr.msra.gmra.mrb[0].mxu0 %v328_v17 }
  0x92   : > { %1660 = vmatprep.mubr.msk.bf16.mxu1 %vm2094_vm0, %v2093_v0  ;;  %1654 = vmatprep.mubr.msk.bf16.mxu0 %vm2094_vm0, %v2093_v0 }
  0x93   : > { %1639 = vmatpush3.bf16.msra.mxu0 %v1841_v37 }
  0x94   : > { %1640 = vmatprep.subr.bf16.mxu0 %v2093_v0 }
  0x97   : > { %1641 = vmatpush3.bf16.msra.mxu0 %v1842_v38 }
  0x98   : > { %1642 = vmatprep.subr.bf16.mxu0 %v2093_v0 }
  0x9b   : > { %1643 = vmatpush3.bf16.msra.mxu0 %v1843_v39 }
  0x9c   : > { %1644 = vmatprep.subr.bf16.mxu0 %v2093_v0 }
  0x9f   : > { %1645 = vmatpush3.bf16.msra.mxu0 %v1844_v40 }
  0xa0   : > { %1646 = vmatprep.subr.bf16.mxu0 %v2093_v0 }
  0xa3   : > { %1647 = vmatpush3.bf16.msra.mxu0 %v1845_v41 }
  0xa4   : > { %1648 = vmatprep.subr.bf16.mxu0 %v2093_v0 }
  0xa7   : > { %1649 = vmatpush3.bf16.msra.mxu0 %v1846_v42 }
  0xa8   : > { %1650 = vmatprep.subr.bf16.mxu0 %v2093_v0 }
  0xab   : > { %1651 = vmatpush3.bf16.msra.mxu0 %v1847_v43 }
  0xac   : > { %1652 = vmatprep.subr.bf16.mxu0 %v2093_v0 }
  0xaf   : > { %1653 = vmatpush3.bf16.msra.mxu0 %v1848_v44 }
  0xb0   : > { %1706 = vmatprep.subr.bf16.mxu0 %v2093_v0 }
  0xb2   : > { %1655 = vmatmul.mubr.bf16.vlgmr.msra.gmra.mrb[4].mxu0 %v328_v17 }
  0xb3   : > { %1722 = vmatprep.mubr.msk.bf16.mxu0 %vm2094_vm0, %v2093_v0 }
 0x164   : > { %v547_v19 = vpop.f32.mrb[0].mxu1  ;;  %v434_v24 = vpop.f32.mrb[0].mxu0 }
 0x165   : > { %v548_v21 = vadd.f32 %v1496_v18, %v547_v19  ;;  %v1636_v22 = vpop.f32.mrb[1].mxu1  ;;  %v435_v27 = vadd.f32 %v1487_v20, %v434_v24  ;;  %v1616_v28 = vpop.f32.mrb[1].mxu0 }
 0x166   : > { %v550_v23 = vpop.f32.mrb[2].mxu1  ;;  %v437_v29 = vpop.f32.mrb[2].mxu0 }
 0x167   : > { %v553_v25 = vpack.c.bf16 %v548_v21, %v548_v21  ;;  %v1637_v26 = vpop.f32.mrb[3].mxu1  ;;  %v440_v30 = vpack.c.bf16 %v435_v27, %v435_v27  ;;  %v1617_v31 = vpop.f32.mrb[3].mxu0 }
 0x169   : > { %554 = vst [vmem:[#allocation2 + $0x4] sm:$0xf] %v553_v25  ;;  %441 = vst [vmem:[#allocation2] sm:$0xf] %v440_v30 }
 0x170   : > { %v675_v32 = vld [vmem:[#allocation2 + $0x4] sm:$0xf]  ;;  %v1840_v35 = vld [vmem:[#allocation2] ss:$0 sps:$4 sm:$0xff]  }
 0x171   : > { %v1839_v33 = vld [vmem:[#allocation2 + $0x4] ss:$0 sps:$4 sm:$0xff]   ;;  %v682_v34 = vsel %vm677_vm1, %v675_v32, 0  ;;  %v674_v36 = vld [vmem:[#allocation2] sm:$0xf] }
 0x172   : > { %1659 = vmatpush3.bf16.xpose.msra.mxu1 %v682_v34  ;;  %798 = vrot.lane.b32.xlu1 %v1839_v33, %s2095_s10  ;;  %v1850_v18 = vld [vmem:[#allocation2 + $0x4] ss:$0 sps:$4 sm:$0xff]   ;;  %v1851_v19 = vld [vmem:[#allocation2] ss:$0 sps:$4 sm:$0xff]  }
 0x173   : > { %1664 = vmatprep.subr.bf16.mxu1 %v2093_v0 }
 0x176   : > { %793 = vrot.lane.b32.xlu1 %v1840_v35, %s2095_s10 }
 0x179   : > { %1661 = vmatmul.mubr.msk.bf16.vlgmr.msra.gmra.mrb[4].mxu1 %vm677_vm1, %v674_v36 }
 0x17a   : > { %1666 = vmatprep.mubr.msk.bf16.mxu1 %vm2094_vm0, %v2093_v0 }
 0x185   : > { %v660_v51 = vpop.f32.mrb[4].mxu0 }
 0x186   : > { %v661_v52 = vadd.f32 %v1505_v50, %v660_v51  ;;  %v1656_v53 = vpop.f32.mrb[5].mxu0 }
 0x187   : > { %v663_v54 = vpop.f32.mrb[6].mxu0  ;;  %v1853_v53 = vld [vmem:[#allocation2 + $0x4] ss:$0 sps:$4 sm:$0xff]  }
 0x188   : > { %v666_v55 = vpack.c.bf16 %v661_v52, %v661_v52  ;;  %v1657_v56 = vpop.f32.mrb[7].mxu0  ;;  %v1854_v54 = vld [vmem:[#allocation2] ss:$0 sps:$4 sm:$0xff]  }
 0x18a   : > { %667 = vst [vmem:[#allocation2 + $0x8] sm:$0xf] %v666_v55 }
 0x191   : > { %v676_v62 = vld [vmem:[#allocation2 + $0x8] sm:$0xf] }
 0x192   : > { %v744_v63 = vsel %vm742_vm3, %v676_v62, 0  ;;  %v1849_v17 = vld [vmem:[#allocation2 + $0x8] ss:$0 sps:$4 sm:$0xff]  }
 0x193   : > { %1665 = vmatpush3.bf16.msra.mxu1 %v744_v63  ;;  %v1852_v27 = vld [vmem:[#allocation2 + $0x8] ss:$0 sps:$4 sm:$0xff]  }
 0x194   : > { %1670 = vmatprep.subr.bf16.mxu1 %v2093_v0 }
 0x1e4   : > { %v799_v4 = vpop.permute.xlu1 %798 }
 0x1e5   : > { %v804_v6 = vsel %vm677_vm1, %v799_v4, 0 }
 0x1e8   : > { %v794_v7 = vpop.permute.xlu1 %793 }
 0x24c   : > { %v718_v45 = vpop.f32.mrb[4].mxu1 }
 0x24d   : > { %v1662_v46 = vpop.f32.mrb[5].mxu1  ;;  %v725_v47 = vsel %vm724_vm2, %v718_v45, -inf }
 0x24e   : > { %726 = vmax.xlane.f32.xlu0 %v725_v47  ;;  %v721_v48 = vpop.f32.mrb[6].mxu1 }
 0x24f   : > { %v1663_v49 = vpop.f32.mrb[7].mxu1 }
 0x2db   : > { %v727_v57 = vpop.xlane.xlu0 %726 }
 0x2dc   : > { %v728_v58 = vsub.f32 %v718_v45, %v727_v57 }
 0x2de   : > { %v729_v59 = vmul.f32 1.442695, %v728_v58 }
 0x2e0   : > { %1864 = vpow2.f32 %v729_v59 }
 0x2ea   : > { %v1865_v60 = vpop.eup %1864 }
 0x2eb   : > { %v731_v61 = vsel %vm724_vm2, %v1865_v60, 0.0 }
 0x2ec   : > { %732 = vadd.xlane.f32.xlu0 %v731_v61 }
 0x379   : > { %v733_v1 = vpop.xlane.xlu0 %732 }
 0x37a   : > { %1866 = vrcp.f32 %v733_v1 }
 0x384   : > { %v1867_v2 = vpop.eup %1866 }
 0x385   : > { %v736_v3 = vmul.f32 %v1867_v2, %v1865_v60 }
 0x387   : > { %v738_v5 = vpack.c.bf16 %v736_v3, %v736_v3  ;;  %737 = vst.msk [vmem:[%s2394_s30] sm:$0xff] %vm724_vm2, %v736_v3 }
 0x389   : > { %1667 = vmatmul.mubr.msk.bf16.vlgmr.msra.gmra.mrb[8].mxu1 %vm724_vm2, %v738_v5 }
 0x38a   : > { %1671 = vmatpush3.bf16.xpose.msra.mxu1 %v804_v6  ;;  %1672 = vmatprep.mubr.msk.bf16.mxu1 %vm2094_vm0, %v2093_v0 }
 0x38b   : > { %1676 = vmatprep.subr.bf16.mxu1 %v2093_v0 }
 0x38e   : > { %v858_v32 = vld [vmem:[%s2394_s30] sm:$0xff] }
 0x391   : > { %1673 = vmatmul.mubr.msk.bf16.vlgmr.msra.gmra.mrb[12].mxu1 %vm677_vm1, %v794_v7 }
 0x392   : > { %1678 = vmatprep.mubr.msk.bf16.mxu1 %vm2094_vm0, %v2093_v0 }
 0x45c   : > { %v2406_v8 = vpop.f32.mrb[8].mxu1 }
 0x45d   : > { %v1668_v9 = vpop.f32.mrb[9].mxu1 }
 0x45e   : > { %v783_v10 = vpop.f32.mrb[10].mxu1 }
 0x45f   : > { %v1669_v11 = vpop.f32.mrb[11].mxu1 }
 0x460   : > { %v1855_v11 = vld [vmem:[#allocation2 + $0x8] ss:$0 sps:$4 sm:$0xff]  }
 0x464   : > { %v840_v12 = vpop.f32.mrb[12].mxu1 }
 0x465   : > { %v1674_v13 = vpop.f32.mrb[13].mxu1  ;;  %v846_v14 = vsel %vm724_vm2, %v840_v12, -inf }
 0x466   : > { %847 = vmax.xlane.f32.xlu0 %v846_v14  ;;  %v843_v15 = vpop.f32.mrb[14].mxu1 }
 0x467   : > { %v1675_v16 = vpop.f32.mrb[15].mxu1 }
 0x47c   : > { %865 = vrot.lane.b32.xlu0 %v1849_v17, %s2095_s10 }
 0x480   : > { %925 = vrot.lane.b32.xlu0 %v1850_v18, %s2096_s12 }
 0x484   : > { %920 = vrot.lane.b32.xlu0 %v1851_v19, %s2096_s12 }
 0x4f3   : > { %v848_v20 = vpop.xlane.xlu0 %847 }
 0x4f4   : > { %v849_v21 = vsub.f32 %v840_v12, %v848_v20 }
 0x4f6   : > { %v850_v22 = vmul.f32 1.442695, %v849_v21 }
 0x4f7   : > { %v866_v23 = vpop.permute.xlu0 %865 }
 0x4f8   : > { %1868 = vpow2.f32 %v850_v22  ;;  %v871_v24 = vsel %vm742_vm3, %v866_v23, 0 }
 0x4f9   : > { %1677 = vmatpush3.bf16.msra.mxu1 %v871_v24 }
 0x4fa   : > { %1682 = vmatprep.subr.bf16.mxu1 %v2093_v0 }
 0x4fb   : > { %v926_v31 = vpop.permute.xlu0 %925 }
 0x4fc   : > { %v931_v35 = vsel %vm677_vm1, %v926_v31, 0  ;;  %v1858_v31 = vld [vmem:[#allocation9 + $0x10] sm:$0xff]  }
 0x4ff   : > { %v921_v37 = vpop.permute.xlu0 %920 }
 0x502   : > { %v1869_v25 = vpop.eup %1868 }
 0x503   : > { %v852_v26 = vsel %vm724_vm2, %v1869_v25, 0.0 }
 0x504   : > { %853 = vadd.xlane.f32.xlu1 %v852_v26 }
 0x515   : > { %992 = vrot.lane.b32.xlu1 %v1852_v27, %s2096_s12 }
 0x591   : > { %v854_v28 = vpop.xlane.xlu1 %853 }
 0x592   : > { %1870 = vrcp.f32 %v854_v28 }
 0x595   : > { %v993_v36 = vpop.permute.xlu1 %992 }
 0x596   : > { %v998_v38 = vsel %vm742_vm3, %v993_v36, 0  ;;  %v1863_v36 = vld [vmem:[#allocation9 + $0x38] sm:$0xff]  }
 0x59c   : > { %v1871_v29 = vpop.eup %1870 }
 0x59d   : > { %v857_v30 = vmul.f32 %v1871_v29, %v1869_v25  ;;  %v1856_v29 = vld [vmem:[#allocation9] sm:$0xff]  }
 0x59e   : > { %1707 = vmatpush3.bf16.msra.mxu0 %v1856_v29 }
 0x59f   : > { %v861_v33 = vpack.c.bf16 %v857_v30, %v857_v30  ;;  %v859_v34 = vadd.f32 %v858_v32, %v857_v30  ;;  %v1857_v30 = vld [vmem:[#allocation9 + $0x8] sm:$0xff]   ;;  %1708 = vmatprep.subr.bf16.mxu0 %v2093_v0  ;;  %v1859_v32 = vld [vmem:[#allocation9 + $0x18] sm:$0xff]  }
 0x5a1   : > { %1679 = vmatmul.mubr.msk.bf16.vlgmr.msra.gmra.mrb[16].mxu1 %vm724_vm2, %v861_v33  ;;  %860 = vst.msk [vmem:[%s2394_s30] sm:$0xff] %vm724_vm2, %v859_v34  ;;  %v1860_v33 = vld [vmem:[#allocation9 + $0x20] sm:$0xff]   ;;  %v1861_v34 = vld [vmem:[#allocation9 + $0x28] sm:$0xff]  }
 0x5a2   : > { %1683 = vmatpush3.bf16.xpose.msra.mxu1 %v931_v35  ;;  %1684 = vmatprep.mubr.msk.bf16.mxu1 %vm2094_vm0, %v2093_v0  ;;  %v1862_v35 = vld [vmem:[#allocation9 + $0x30] sm:$0xff]  }
 0x5a3   : > { %1688 = vmatprep.subr.bf16.mxu1 %v2093_v0  ;;  %1709 = vmatpush3.bf16.msra.mxu0 %v1857_v30 }
 0x5a4   : > { %1710 = vmatprep.subr.bf16.mxu0 %v2093_v0 }
 0x5a7   : > { %1711 = vmatpush3.bf16.msra.mxu0 %v1858_v31 }
 0x5a8   : > { %v985_v59 = vld [vmem:[%s2394_s30] sm:$0xff]  ;;  %1712 = vmatprep.subr.bf16.mxu0 %v2093_v0 }
 0x5a9   : > { %1685 = vmatmul.mubr.msk.bf16.vlgmr.msra.gmra.mrb[20].mxu1 %vm677_vm1, %v921_v37 }
 0x5aa   : > { %1689 = vmatpush3.bf16.msra.mxu1 %v998_v38  ;;  %1690 = vmatprep.mubr.msk.bf16.mxu1 %vm2094_vm0, %v2093_v0 }
 0x5ab   : > { %1694 = vmatprep.subr.bf16.mxu1 %v2093_v0  ;;  %1713 = vmatpush3.bf16.msra.mxu0 %v1859_v32 }
 0x5ac   : > { %1714 = vmatprep.subr.bf16.mxu0 %v2093_v0 }
 0x5af   : > { %1715 = vmatpush3.bf16.msra.mxu0 %v1860_v33 }
 0x5b0   : > { %1716 = vmatprep.subr.bf16.mxu0 %v2093_v0 }
 0x5b3   : > { %1717 = vmatpush3.bf16.msra.mxu0 %v1861_v34 }
 0x5b4   : > { %1718 = vmatprep.subr.bf16.mxu0 %v2093_v0 }
 0x5b7   : > { %1719 = vmatpush3.bf16.msra.mxu0 %v1862_v35 }
 0x5b8   : > { %1720 = vmatprep.subr.bf16.mxu0 %v2093_v0 }
 0x5bb   : > { %1721 = vmatpush3.bf16.msra.mxu0 %v1863_v36 }
 0x674   : > { %v907_v39 = vpop.f32.mrb[16].mxu1 }
 0x675   : > { %v1680_v40 = vpop.f32.mrb[17].mxu1  ;;  %v913_v12 = vpack.c.bf16 %v907_v39, %v907_v39 }
 0x676   : > { %v910_v41 = vpop.f32.mrb[18].mxu1 }
 0x677   : > { %v1681_v42 = vpop.f32.mrb[19].mxu1 }
 0x67c   : > { %v967_v43 = vpop.f32.mrb[20].mxu1 }
 0x67d   : > { %v1686_v44 = vpop.f32.mrb[21].mxu1  ;;  %v973_v45 = vsel %vm724_vm2, %v967_v43, -inf }
 0x67e   : > { %974 = vmax.xlane.f32.xlu0 %v973_v45  ;;  %v970_v46 = vpop.f32.mrb[22].mxu1  ;;  %v786_v44 = vpack.c.bf16 %v2406_v8, %v2406_v8 }
 0x67f   : > { %v1687_v47 = vpop.f32.mrb[23].mxu1 }
 0x70b   : > { %v975_v48 = vpop.xlane.xlu0 %974 }
 0x70c   : > { %v976_v49 = vsub.f32 %v967_v43, %v975_v48 }
 0x70e   : > { %v977_v50 = vmul.f32 1.442695, %v976_v49 }
 0x710   : > { %1872 = vpow2.f32 %v977_v50 }
 0x71a   : > { %v1873_v51 = vpop.eup %1872 }
 0x71b   : > { %v979_v52 = vsel %vm724_vm2, %v1873_v51, 0.0 }
 0x71c   : > { %980 = vadd.xlane.f32.xlu1 %v979_v52 }
 0x72d   : > { %1052 = vrot.lane.b32.xlu1 %v1853_v53, %s2097_s14 }
 0x731   : > { %1047 = vrot.lane.b32.xlu1 %v1854_v54, %s2097_s14 }
 0x7a9   : > { %v981_v55 = vpop.xlane.xlu1 %980 }
 0x7aa   : > { %1874 = vrcp.f32 %v981_v55 }
 0x7ad   : > { %v1053_v58 = vpop.permute.xlu1 %1052 }
 0x7ae   : > { %v1058_v62 = vsel %vm677_vm1, %v1053_v58, 0 }
 0x7b1   : > { %v1048_v63 = vpop.permute.xlu1 %1047 }
 0x7b4   : > { %v1875_v56 = vpop.eup %1874 }
 0x7b5   : > { %v984_v57 = vmul.f32 %v1875_v56, %v1873_v51 }
 0x7b7   : > { %v988_v60 = vpack.c.bf16 %v984_v57, %v984_v57  ;;  %v986_v61 = vadd.f32 %v985_v59, %v984_v57 }
 0x7b9   : > { %1691 = vmatmul.mubr.msk.bf16.vlgmr.msra.gmra.mrb[24].mxu1 %vm724_vm2, %v988_v60  ;;  %987 = vst.msk [vmem:[%s2394_s30] sm:$0xff] %vm724_vm2, %v986_v61 }
 0x7ba   : > { %1695 = vmatpush3.bf16.xpose.msra.mxu1 %v1058_v62  ;;  %1696 = vmatprep.mubr.msk.bf16.mxu1 %vm2094_vm0, %v2093_v0 }
 0x7bb   : > { %1700 = vmatprep.subr.bf16.mxu1 %v2093_v0 }
 0x7c0   : > { %v1112_v24 = vld [vmem:[%s2394_s30] sm:$0xff] }
 0x7c1   : > { %1697 = vmatmul.mubr.msk.bf16.vlgmr.msra.gmra.mrb[28].mxu1 %vm677_vm1, %v1048_v63 }
 0x7c2   : > { %1702 = vmatprep.mubr.msk.bf16.mxu1 %vm2094_vm0, %v2093_v0 }
 0x88c   : > { %v1034_v1 = vpop.f32.mrb[24].mxu1 }
 0x88d   : > { %v1692_v2 = vpop.f32.mrb[25].mxu1  ;;  %v1040_v13 = vpack.c.bf16 %v1034_v1, %v1034_v1 }
 0x88e   : > { %v1037_v3 = vpop.f32.mrb[26].mxu1 }
 0x88f   : > { %v1693_v4 = vpop.f32.mrb[27].mxu1 }
 0x894   : > { %v1094_v5 = vpop.f32.mrb[28].mxu1 }
 0x895   : > { %v1698_v6 = vpop.f32.mrb[29].mxu1  ;;  %v1100_v7 = vsel %vm724_vm2, %v1094_v5, -inf }
 0x896   : > { %1101 = vmax.xlane.f32.xlu0 %v1100_v7  ;;  %v1097_v9 = vpop.f32.mrb[30].mxu1 }
 0x897   : > { %v1699_v10 = vpop.f32.mrb[31].mxu1 }
 0x8ac   : > { %1119 = vrot.lane.b32.xlu0 %v1855_v11, %s2097_s14 }
 0x8b0   : > { %1169 = vrot.lane.b32.xlu0 %v913_v12, %s2097_s14 }
 0x8b4   : > { %1172 = vrot.lane.b32.xlu0 %v1040_v13, %s2096_s12 }
 0x923   : > { %v1102_v14 = vpop.xlane.xlu0 %1101 }
 0x924   : > { %v1103_v15 = vsub.f32 %v1094_v5, %v1102_v14 }
 0x926   : > { %v1104_v16 = vmul.f32 1.442695, %v1103_v15 }
 0x927   : > { %v1120_v17 = vpop.permute.xlu0 %1119 }
 0x928   : > { %1876 = vpow2.f32 %v1104_v16  ;;  %v1125_v18 = vsel %vm742_vm3, %v1120_v17, 0 }
 0x929   : > { %1701 = vmatpush3.bf16.msra.mxu1 %v1125_v18 }
 0x92b   : > { %v1170_v42 = vpop.permute.xlu0 %1169 }
 0x92c   : > { %v1179_v0 = vsel %vm677_vm1, %v786_v44, %v1170_v42 }
 0x92f   : > { %v1173_v43 = vpop.permute.xlu0 %1172 }
 0x930   : > { %v1182_v45 = vsel %vm1180_vm4, %v1179_v0, %v1173_v43 }
 0x932   : > { %v1877_v19 = vpop.eup %1876 }
 0x933   : > { %v1106_v20 = vsel %vm724_vm2, %v1877_v19, 0.0 }
 0x934   : > { %1107 = vadd.xlane.f32.xlu1 %v1106_v20 }
 0x9c1   : > { %v1108_v21 = vpop.xlane.xlu1 %1107 }
 0x9c2   : > { %1878 = vrcp.f32 %v1108_v21 }
 0x9cc   : > { %v1879_v22 = vpop.eup %1878 }
 0x9cd   : > { %v1111_v23 = vmul.f32 %v1879_v22, %v1877_v19 }
 0x9cf   : > { %v1115_v25 = vpack.c.bf16 %v1111_v23, %v1111_v23  ;;  %v1113_v26 = vadd.f32 %v1112_v24, %v1111_v23 }
 0x9d1   : > { %1703 = vmatmul.mubr.msk.bf16.vlgmr.msra.gmra.mrb[32].mxu1 %vm724_vm2, %v1115_v25  ;;  %1114 = vst.msk [vmem:[%s2394_s30] sm:$0xff] %vm724_vm2, %v1113_v26 }
 0x9d8   : > { %v1188_v27 = vld [vmem:[%s2394_s30] sm:$0xff] }
 0x9d9   : > { %v1189_v28 = vmul.f32 0.25, %v1188_v27 }
 0x9db   : > { %1190 = vst.msk [vmem:[%s2394_s30] sm:$0xff] %vm724_vm2, %v1189_v28 }
 0xaa4   : > { %v1161_v37 = vpop.f32.mrb[32].mxu1 }
 0xaa5   : > { %v1167_v38 = vpack.c.bf16 %v1161_v37, %v1161_v37  ;;  %v1704_v39 = vpop.f32.mrb[33].mxu1 }
 0xaa6   : > { %v1164_v40 = vpop.f32.mrb[34].mxu1 }
 0xaa7   : > { %1175 = vrot.lane.b32.xlu0 %v1167_v38, %s2095_s10  ;;  %v1705_v41 = vpop.f32.mrb[35].mxu1  ;;  %s2098_s10 = smov [#allocation11]  }
 0xaa8   : > { %s1970_s13 = sshll.u32 %s2098_s10, 4  ;;  %s1971_s13 = int_to_ptr.vmem [resolvable:$false] %s1970_s13 }
 0xaa9   : > { %s1972_s15 = scalar_lea.vmem %s1971_s13, 256  ;;  %p1973_p3 = scmp.lt.s32.totalorder %s1340_s7, %s1971_s13 }
 0xaaa   : > { %p1974_p5 = scmp.lt.s32.totalorder %s1972_s15, %s1966_s8 }
 0xaac   : > { %p1975_p9 = por %p1974_p5, %p1973_p3 }
 0xaae   : > { %p1976_p11 = pnand %p1975_p9, %p1969_p10 }
 0xb19   : > { %v1176_v46 = vpop.permute.xlu0 %1175 }
 0xb1a   : > { %v1185_v47 = vsel %vm1183_vm5, %v1182_v45, %v1176_v46 }
 0xb1b   : > { %1187 = vst [vmem:[#allocation3] sm:$0xf] %v1185_v47 }
 0xb22   : > { %v1191_v48 = vld [vmem:[#allocation3] sm:$0xf] }
 0xb23   : > { %1723 = vmatmul.mubr.bf16.vlgmr.msra.gmra.mrb[8].mxu0 %v1191_v48 }
 0xb24   : > { %1979 = shalt.err (!%p1976_p11)
}
 0xb25   : > { %s1980_s30 = scalar_lea.hbm %s2474_s29, 128  ;;  %s1984_s28 = scalar_lea.hbm %s2560_s6, 256 }
 0xb26   : > { %p1981_p0 = scmp.ne.s32.totalorder %s2474_s29, %s1980_s30  ;;  %p1985_p6 = scmp.lt.u32.totalorder %s2474_s29, %s2560_s6 }
 0xb27   : > { %p1986_p7 = scmp.lt.u32.totalorder %s1984_s28, %s1980_s30  ;;  %p1988_p8 = scmp.lt.u32.totalorder %s1980_s30, %s2474_s29 }
 0xb28   : > { %p1982_p4 = pnand %p1981_p0, %p2577_p12 }
 0xb29   : > { %p1987_p2 = por %p1986_p7, %p1985_p6 }
 0xb2a   : > { %p1983_p13 = pneg %p1982_p4 }
 0xb2b   : > { %p1989_p1 = por %p1988_p8, %p1987_p2 }
 0xb2d   : > { %p1990_p10 = pnand %p1989_p1, %p1983_p13 }
 0xb2f   : > { %1993 = shalt.err (!%p1990_p10)
}
 0xb30   : > { %1737 = dma.vmem_to_hbm [thread:$0]  (%p2577_p12), %s1340_s7, 128, %s2474_s29, %s1310_s9   ;;  %v1531_v8 = vld [vmem:[%s2558_s4] ss:$0 sm:$0xff] }
 0xb31   : > { %s315_s15 = scalar_lea.vmem [#allocation10], %s1485_s19  ;;  %s2505_s28 = scalar_lea.hbm %s2559_s5, %s1542_s20 }
 0xb32   : > { %s1325_s12 = sshll.u32 %s315_s15, 4  ;;  %s1305_s29 = scalar_lea.sflag [#allocation6], %s2320_s17  ;;  %s2507_s12 = int_to_ptr.vmem [resolvable:$true] %s1325_s12 }
 0xb33   : > { %s1994_s19 = scalar_lea.vmem %s2507_s12, 128  ;;  %s2099_s24 = smov [#allocation10]  }
 0xb34   : > { %p1995_p3 = scmp.ne.s32.totalorder %s2507_s12, %s1994_s19  ;;  %s1998_s7 = sshll.u32 %s2099_s24, 4  ;;  %s1999_s7 = int_to_ptr.vmem [resolvable:$false] %s1998_s7 }
 0xb35   : > { %s2000_s9 = scalar_lea.vmem %s1999_s7, 256  ;;  %p2001_p11 = scmp.lt.s32.totalorder %s2507_s12, %s1999_s7 }
 0xb36   : > { %p1996_p5 = pnand %p1995_p3, %p2577_p12  ;;  %p2002_p0 = scmp.lt.s32.totalorder %s2000_s9, %s1994_s19 }
 0xb38   : > { %p1997_p9 = pneg %p1996_p5  ;;  %p2003_p4 = por %p2002_p0, %p2001_p11 }
 0xb3a   : > { %p2004_p13 = pnand %p2003_p4, %p1997_p9 }
 0xbf6   : > { %v1297_v49 = vpop.f32.mrb[8].mxu0 }
 0xbf7   : > { %v1298_v50 = vadd.f32 %v1531_v8, %v1297_v49  ;;  %v1724_v51 = vpop.f32.mrb[9].mxu0 }
 0xbf8   : > { %v1300_v52 = vpop.f32.mrb[10].mxu0 }
 0xbf9   : > { %1303 = vst [vmem:[%s315_s15] sm:$0xff] %v1298_v50  ;;  %v1725_v53 = vpop.f32.mrb[11].mxu0 }
 0xbfa   : > { %2007 = shalt.err (!%p2004_p13)
}
 0xbfb   : > { %s2008_s17 = scalar_lea.hbm %s2505_s28, 128  ;;  %s2012_s10 = scalar_lea.hbm %s2559_s5, 256 }
 0xbfc   : > { %p2009_p6 = scmp.ne.s32.totalorder %s2505_s28, %s2008_s17  ;;  %p2013_p8 = scmp.lt.u32.totalorder %s2505_s28, %s2559_s5 }
 0xbfd   : > { %p2014_p1 = scmp.lt.u32.totalorder %s2012_s10, %s2008_s17  ;;  %p2016_p3 = scmp.lt.u32.totalorder %s2008_s17, %s2505_s28 }
 0xbfe   : > { %p2010_p7 = pnand %p2009_p6, %p2577_p12 }
 0xbff   : > { %p2015_p10 = por %p2014_p1, %p2013_p8 }
 0xc00   : > { %p2011_p2 = pneg %p2010_p7 }
 0xc01   : > { %p2017_p5 = por %p2016_p3, %p2015_p10 }
 0xc03   : > { %p2018_p9 = pnand %p2017_p5, %p2011_p2 }
 0xc05   : > { %2021 = shalt.err (!%p2018_p9)
}
 0xc06   : > { %1736 = dma.vmem_to_hbm [thread:$0]  (%p2577_p12), %s2507_s12, 128, %s2505_s28, %s1305_s29  }
 0xc07 PF: > { %s2578_s15 = sld [smem:[#allocation17_spill]]  ;;  %s1351_s30 = sand.u32 1, %s2064_s21  }
 0xc08   : > { %p2580_p0 = scmp.ge.s32.totalorder %s2084_s26, 2  ;;  %s1352_s14 = scalar_lea.sflag [#allocation6], %s1351_s30 }
 0xc0d   : > { %p2579_p11 = scmp.ne.s32.totalorder %s2578_s15, 0 }
 0xc0f   : > { %p1752_p4 = pnand %p2580_p0, %p2579_p11 }
 0xc11   : > { %2055 = dma.done.wait (!%p1752_p4), %s1352_s14, 128  }
 0xc12   : > { %2057 = vsyncadd (!%p1752_p4), %s1352_s14, 4294967168  ;;  %s1361_s19 = scalar_lea.sflag [#allocation12], %s1351_s30 }
 0xc13   : > { %2059 = dma.done.wait (!%p1752_p4), %s1361_s19, 128  }
 0xc14   : > { %2061 = vsyncadd (!%p1752_p4), %s1361_s19, 4294967168  ;;  %s27_s26 = sadd.s32 1, %s2084_s26   ;;  %s2581_s21 = smov %s2068_s22 }
 0xc15   : > { %p24_p13 = scmp.ge.s32.totalorder %s27_s26, 4   ;;  %s2582_s22 = smov %s2072_s23 }
 0xc16   : > { %s2583_s23 = smov %s2277_s27  ;;  %s2584_s24 = smov %s2080_s25 }
 0xc17   : > { %s2585_s25 = smov %s2587_s16  ;;  %26 = sbr.rel (!%p24_p13) target bundleno = 9 (0x9), region = 115 }
 0xc1e   :  { %1366 = vsyncpa [#allocation5], 1 }
 0xc1f   :  { %1368 = vsyncpa [#allocation5 + $0x1], 1 }
 0xc20   :  { %1369 = vsyncpa [#allocation8], 1 }
 0xc21   :  { %1370 = vsyncpa [#allocation6], 1 }
 0xc22   :  { %1372 = vsyncpa [#allocation6 + $0x1], 1 }
 0xc23   :  { %1373 = vsyncpa [#allocation12], 1 }
 0xc24   :  { %1375 = vsyncpa [#allocation12 + $0x1], 1 }

</bundles_post_ra>
